<compile_context>
chip_gen: v7x
topology: tpu7x:2x2x1
jax: 0.10.0
libtpu: 0.0.40
codegen_flags: <defaults>
</compile_context>

<pallas_src>
import jax
import jax.numpy as jnp
from jax.experimental import pallas as pl
from jax.experimental.pallas import tpu as pltpu

_LANE = 128
_SUBLANE = 8
_CHUNK_ROWS = 1024  # rows processed per inner step (multiple of 128)


def _round_up(x: int, m: int) -> int:
    return ((x + m - 1) // m) * m


def _cdiv(a: int, b: int) -> int:
    return (a + b - 1) // b


def _agg_kernel(x_ref, w_ref, o_ref):
    # x_ref: (tile_n, f)             input rows for this grid step
    # w_ref: (1, f)                  weight row (same block every step)
    # o_ref: (1, tile_n//128, 128)   lane-dense scores; row-major == row order
    tile_n, _ = x_ref.shape
    w = w_ref[...].astype(jnp.float32)  # (1, f), broadcasts over rows

    # One-hot (k == j) mask used to move per-row scores (one per sublane) into
    # a lane-dense (groups, 128) slab.  Hoisted out of the chunk loop.
    sub = jax.lax.broadcasted_iota(jnp.int32, (1, _LANE, _LANE), 1)
    lane = jax.lax.broadcasted_iota(jnp.int32, (1, _LANE, _LANE), 2)
    diag = sub == lane  # (1, 128, 128) bool

    for c0 in range(0, tile_n, _CHUNK_ROWS):
        c1 = min(c0 + _CHUNK_ROWS, tile_n)
        rows = c1 - c0                                   # multiple of 128
        xc = x_ref[c0:c1, :].astype(jnp.float32)         # (rows, f)

        # Per-row dot with the weight row: VPU multiply + lane reduction.
        s = jnp.sum(xc * w, axis=1, keepdims=True)       # (rows, 1) f32

        # Column -> lane-dense relayout: (rows, 1) -> (rows//128, 128).
        # Use jnp.where (select), not multiply-by-mask: garbage rows of a
        # ragged final block may hold NaN/Inf and NaN * 0 would poison valid
        # lanes; select keeps every output strictly row-local.
        s3 = s.reshape(rows // _LANE, _LANE, 1)          # layout-trivial split
        dense = jnp.sum(jnp.where(diag, s3, 0.0), axis=1)  # (rows//128, 128)

        # Sigmoid on the tiny dense slab (EUP), then unmasked lane-dense store.
        sig = 1.0 / (1.0 + jnp.exp(-dense))
        o_ref[0, c0 // _LANE:c1 // _LANE, :] = sig.astype(o_ref.dtype)


def _pick_tile_n(n: int, f_size: int, itemsize: int, target_block_bytes: int) -> int:
    """Largest row tile (multiple of 128) whose padded VMEM block stays modest."""
    f_lanes = _round_up(f_size, _LANE)
    t = target_block_bytes // (f_lanes * itemsize)
    t = max(_LANE, min(32768, (t // _LANE) * _LANE))
    # Cap at ~ceil(n/2) so the grid has >= 2 steps when N allows it (lets
    # v7x's two TensorCores split the row tiles; near-free on v5e/v6e).
    half = _round_up(_cdiv(n, 2), _LANE)
    return min(t, half)


def aggregation_layer(tgt: jax.Array, weight: jax.Array) -> jax.Array:
    """tgt: (N, f_size); weight: (1, f_size) (torch nn.Linear layout). Returns (N,)."""
    n, f_size = tgt.shape
    assert weight.shape == (1, f_size)
    itemsize = jnp.dtype(tgt.dtype).itemsize

    # Generation-aware VMEM budget: 48 MiB on v7x (64 MiB parts), 96 MiB on
    # v5e/v6e (128 MiB parts); conservative fallback if the query fails.
    try:
        vmem_cap = int(pltpu.get_tpu_info().vmem_capacity_bytes)
    except Exception:
        vmem_cap = 64 * 1024 * 1024
    vmem_budget = (3 * vmem_cap) // 4
    target_block_bytes = min(16 * 1024 * 1024, vmem_budget // 4)

    tile_n = _pick_tile_n(n, f_size, itemsize, target_block_bytes)
    grid_n = _cdiv(n, tile_n)
    groups = tile_n // _LANE

    cost = pl.CostEstimate(
        flops=2 * n * f_size,
        transcendentals=n,
        bytes_accessed=(n * f_size + n + f_size) * itemsize,
    )

    out = pl.pallas_call(
        _agg_kernel,
        out_shape=jax.ShapeDtypeStruct((grid_n, groups, _LANE), tgt.dtype),
        grid_spec=pltpu.PrefetchScalarGridSpec(
            num_scalar_prefetch=0,
            grid=(grid_n,),
            in_specs=[
                pl.BlockSpec((tile_n, f_size), lambda i: (i, 0)),
                pl.BlockSpec((1, f_size), lambda i: (0, 0)),
            ],
            out_specs=pl.BlockSpec((1, groups, _LANE), lambda i: (i, 0, 0)),
        ),
        compiler_params=pltpu.CompilerParams(
            dimension_semantics=("parallel",),
            vmem_limit_bytes=int(vmem_budget),
        ),
        cost_estimate=cost,
    )(tgt, weight)

    # (grid_n, tile_n//128, 128) row-major flatten == original row order; drop
    # the ragged-tail garbage rows >= N.  == torch's .squeeze(1).
    return out.reshape(-1)[:n]


if __name__ == "__main__":
    key = jax.random.PRNGKey(0)
    k_x, k_w = jax.random.split(key)

    N, F_SIZE = 16, 32
    tgt = jax.random.normal(k_x, (N, F_SIZE), dtype=jnp.float32)

    # Deterministic init matching nn.Linear default: U(-1/sqrt(f), 1/sqrt(f)).
    bound = 1.0 / (F_SIZE ** 0.5)
    weight = jax.random.uniform(k_w, (1, F_SIZE), minval=-bound, maxval=bound,
                                dtype=jnp.float32)

    out = jax.block_until_ready(aggregation_layer(tgt, weight))
    # Exact-f32 reference (same math as the kernel: elementwise mul + sum).
    ref = jax.nn.sigmoid(jnp.sum(tgt * weight, axis=1))
    assert out.shape == (N,)
    assert jnp.allclose(out, ref, atol=1e-5, rtol=1e-5)

    # Ragged N (not a multiple of the tile): exercises the unpadded partial
    # final block and the grid >= 2 path.
    N2 = 300
    tgt2 = jax.random.normal(k_x, (N2, F_SIZE), dtype=jnp.float32)
    out2 = jax.block_until_ready(aggregation_layer(tgt2, weight))
    ref2 = jax.nn.sigmoid(jnp.sum(tgt2 * weight, axis=1))
    assert out2.shape == (N2,)
    assert jnp.allclose(out2, ref2, atol=1e-5, rtol=1e-5)

    print("KERNEL_OK")
</pallas_src>

<mosaic_0001>
module attributes {stable_mosaic.version = 11 : i64} {
  func.func @_agg_kernel(%arg0: i32, %arg1: memref<128x32xf32, #tpu.memory_space<vmem>>, %arg2: memref<1x32xf32, #tpu.memory_space<vmem>>, %arg3: memref<1x1x128xf32, #tpu.memory_space<vmem>>) attributes {dimension_semantics = [#tpu.dimension_semantics<parallel>], iteration_bounds = array<i64: 1>, scalar_prefetch = 0 : i64, scratch_operands = 0 : i64, tpu.core_type = #tpu.core_type<tc>, window_params = [{transform_indices = @transform_0, window_bounds = array<i64: 128, 32>}, {pipeline_mode = #tpu.pipeline_mode<synchronous>, transform_indices = @transform_1, window_bounds = array<i64: 1, 32>}, {transform_indices = @transform_2, window_bounds = array<i64: 1, 1, 128>}]} {
    %c0 = arith.constant 0 : index
    %c0_0 = arith.constant 0 : index
    %0 = vector.load %arg2[%c0, %c0_0] : memref<1x32xf32, #tpu.memory_space<vmem>>, vector<1x32xf32>
    %1 = tpu.iota {dimensions = array<i32: 1>} : vector<1x128x128xi32>
    %2 = tpu.iota {dimensions = array<i32: 2>} : vector<1x128x128xi32>
    %3 = arith.cmpi eq, %1, %2 : vector<1x128x128xi32>
    %c0_1 = arith.constant 0 : index
    %c0_2 = arith.constant 0 : index
    %4 = vector.load %arg1[%c0_1, %c0_2] : memref<128x32xf32, #tpu.memory_space<vmem>>, vector<128x32xf32>
    %5 = vector.broadcast %0 : vector<1x32xf32> to vector<128x32xf32>
    %6 = arith.mulf %4, %5 : vector<128x32xf32>
    %cst = arith.constant dense<0.000000e+00> : vector<128xf32>
    %7 = vector.multi_reduction <add>, %6, %cst [1] : vector<128x32xf32> to vector<128xf32>
    %8 = vector.shape_cast %7 : vector<128xf32> to vector<128x1xf32>
    %9 = vector.shape_cast %8 : vector<128x1xf32> to vector<1x128x1xf32>
    %cst_3 = arith.constant 0.000000e+00 : f32
    %10 = vector.shape_cast %9 : vector<1x128x1xf32> to vector<1x128x1xf32>
    %11 = vector.broadcast %10 : vector<1x128x1xf32> to vector<1x128x128xf32>
    %12 = vector.broadcast %cst_3 : f32 to vector<1x128x128xf32>
    %13 = arith.select %3, %11, %12 : vector<1x128x128xi1>, vector<1x128x128xf32>
    %cst_4 = arith.constant dense<0.000000e+00> : vector<1x128xf32>
    %14 = vector.multi_reduction <add>, %13, %cst_4 [1] : vector<1x128x128xf32> to vector<1x128xf32>
    %cst_5 = arith.constant 0.000000e+00 : f32
    %15 = vector.broadcast %cst_5 : f32 to vector<1x128xf32>
    %16 = arith.subf %15, %14 : vector<1x128xf32>
    %17 = math.exp %16 : vector<1x128xf32>
    %cst_6 = arith.constant 1.000000e+00 : f32
    %18 = vector.broadcast %cst_6 : f32 to vector<1x128xf32>
    %19 = arith.addf %18, %17 : vector<1x128xf32>
    %cst_7 = arith.constant 1.000000e+00 : f32
    %20 = vector.broadcast %cst_7 : f32 to vector<1x128xf32>
    %21 = arith.divf %20, %19 : vector<1x128xf32>
    %c0_8 = arith.constant 0 : index
    %c0_9 = arith.constant 0 : index
    %c0_10 = arith.constant 0 : index
    %22 = vector.load %arg3[%c0_8, %c0_9, %c0_10] : memref<1x1x128xf32, #tpu.memory_space<vmem>>, vector<1x1x128xf32>
    %23 = vector.shape_cast %22 : vector<1x1x128xf32> to vector<1x128xf32>
    %24 = vector.shape_cast %21 : vector<1x128xf32> to vector<1x1x128xf32>
    tpu.vector_store %arg3[%c0_8, %c0_9, %c0_10], %24 {strides = array<i32>} : memref<1x1x128xf32, #tpu.memory_space<vmem>>, vector<1x1x128xf32>,
    return
  }
  func.func @transform_0(%arg0: i32) -> (i32, i32) {
    %c0_i32 = arith.constant 0 : i32
    %c0_i32_0 = arith.constant 0 : i32
    return %arg0, %c0_i32 : i32, i32
  }
  func.func @transform_1(%arg0: i32) -> (i32, i32) {
    %c0_i32 = arith.constant 0 : i32
    %c0_i32_0 = arith.constant 0 : i32
    %c0_i32_1 = arith.constant 0 : i32
    return %c0_i32, %c0_i32_0 : i32, i32
  }
  func.func @transform_2(%arg0: i32) -> (i32, i32, i32) {
    %c0_i32 = arith.constant 0 : i32
    %c0_i32_0 = arith.constant 0 : i32
    %c0_i32_1 = arith.constant 0 : i32
    return %arg0, %c0_i32, %c0_i32_0 : i32, i32, i32
  }
}

</mosaic_0001>

<bundles_post_ra>
// kernel: tpu_custom_call.1
= control target key start
LH: loop header
LB: loop body
LE: loop exit
PB: predicated region body
PF: predicated region fallthrough
CT: control target
= control target key end

     0   :  { %7 = vsyncpa [#allocation3], 0  ;;  %s363_s0 = inlined_call_operand.hbm [shape: f32[16,32], index: 0, kind: input, shape index: {}]   ;;  %s364_s1 = inlined_call_operand.vmem [shape: f32[1,32], index: 1, kind: input, shape index: {}]   ;;  %s365_s2 = inlined_call_operand.hbm [shape: f32[1,1,128], index: 2, kind: output, shape index: {}]  }
   0x1   :  { %8 = vsyncpa [#allocation4], 0 }
   0x2   :  { %13 = vsyncadd [#allocation3], 1792  ;;  %s265_s9 = smov [#allocation2]   ;;  %s217_s13 = scalar_lea.hbm %s363_s0, 256 }
   0x3   :  { %s14_s10 = sshll.u32 %s265_s9, 4  ;;  %p218_p0 = scmp.ne.s32.totalorder %s363_s0, %s217_s13  ;;  %s15_s10 = int_to_ptr.vmem [resolvable:$true] %s14_s10 }
   0x4   :  { %p221_p1 = scmp.lt.u32.totalorder %s217_s13, %s363_s0 }
   0x6   :  { %p223_p2 = pnand %p221_p1, %p218_p0 }
   0x8   :  { %226 = shalt.err (!%p223_p2)
}
   0x9   :  { %s227_s18 = scalar_lea.vmem %s15_s10, 256  ;;  %s231_s19 = scalar_lea.vmem %s15_s10, 2048 }
   0xa   :  { %p228_p3 = scmp.ne.s32.totalorder %s15_s10, %s227_s18  ;;  %p232_p4 = scmp.lt.s32.totalorder %s15_s10, %s15_s10 }
   0xb   :  { %p233_p5 = scmp.lt.s32.totalorder %s231_s19, %s227_s18 }
   0xd   :  { %p234_p6 = por %p233_p5, %p232_p4 }
   0xf   :  { %p235_p7 = pnand %p234_p6, %p228_p3 }
  0x11   :  { %238 = shalt.err (!%p235_p7)
}
  0x12   :  { %s266_s20 = smov 128   ;;  %s267_s21 = smov 8  }
  0x13   :  { %20 = dma.hbm_to_vmem [thread:$0]  %s363_s0, 256, %s15_s10, [#allocation3], %s266_s20, %s266_s20, %s267_s21  }
  0x14   :  { %261 = dma.done.wait [#allocation3], 2048  }
  0x15   :  { %262 = vsyncadd [#allocation3], 4294965248  ;;  %v208_v0 = vld [vmem:[%s364_s1] ss:$0 sm:$0xff]  ;;  %vm100_vm0 = vcmask 261120   ;;  %v64_v2 = vld [vmem:[#allocation2 + $0x10] sm:$0xff]  ;;  %v27_v49 = vlaneseq }
  0x16   :  { %v62_v1 = vld [vmem:[#allocation2] sm:$0xff]  ;;  %v86_v4 = vmul.f32 %v208_v0, %v64_v2  ;;  %v63_v5 = vld [vmem:[#allocation2 + $0x8] sm:$0xff]  ;;  %v65_v6 = vld [vmem:[#allocation2 + $0x18] sm:$0xff]  ;;  %s268_s0 = smov [#allocation5]  }
  0x17   :  { %v84_v3 = vmul.f32 %v208_v0, %v62_v1  ;;  %v85_v7 = vmul.f32 %v208_v0, %v63_v5  ;;  %v87_v8 = vmul.f32 %v208_v0, %v65_v6  ;;  %v66_v9 = vld [vmem:[#allocation2 + $0x20] sm:$0xff]  ;;  %v67_v10 = vld [vmem:[#allocation2 + $0x28] sm:$0xff]  ;;  %v68_v17 = vld [vmem:[#allocation2 + $0x30] sm:$0xff]  ;;  %v315_v50 = vshrl.u32 %v27_v49, 7  ;;  %s199_s1 = sshll.u32 %s268_s0, 4  ;;  %s200_s1 = int_to_ptr.vmem [resolvable:$true] %s199_s1 }
  0x18   :  { %v107_v12 = vsel %vm100_vm0, %v86_v4, 0.0  ;;  %v88_v15 = vmul.f32 %v208_v0, %v66_v9  ;;  %v89_v16 = vmul.f32 %v208_v0, %v67_v10  ;;  %v69_v18 = vld [vmem:[#allocation2 + $0x38] sm:$0xff]  ;;  %v90_v21 = vmul.f32 %v208_v0, %v68_v17  ;;  %v70_v23 = vld [vmem:[#allocation2 + $0x40] sm:$0xff]  ;;  %v71_v24 = vld [vmem:[#allocation2 + $0x48] sm:$0xff]  ;;  %s239_s26 = scalar_lea.vmem %s200_s1, 16  ;;  %s243_s27 = scalar_lea.vmem %s200_s1, 32 }
  0x19   :  { %v101_v11 = vsel %vm100_vm0, %v84_v3, 0.0  ;;  %108 = vadd.xlane.f32.xlu1 %v107_v12  ;;  %v104_v13 = vsel %vm100_vm0, %v85_v7, 0.0  ;;  %v110_v14 = vsel %vm100_vm0, %v87_v8, 0.0  ;;  %v91_v22 = vmul.f32 %v208_v0, %v69_v18  ;;  %v72_v29 = vld [vmem:[#allocation2 + $0x50] sm:$0xff]  ;;  %v73_v30 = vld [vmem:[#allocation2 + $0x58] sm:$0xff]  ;;  %v74_v35 = vld [vmem:[#allocation2 + $0x60] sm:$0xff]  ;;  %p240_p8 = scmp.ne.s32.totalorder %s200_s1, %s239_s26  ;;  %p244_p9 = scmp.lt.s32.totalorder %s200_s1, %s200_s1 }
  0x1a   :  { %102 = vadd.xlane.f32.xlu0 %v101_v11  ;;  %v113_v19 = vsel %vm100_vm0, %v88_v15, 0.0  ;;  %v116_v20 = vsel %vm100_vm0, %v89_v16, 0.0  ;;  %v119_v25 = vsel %vm100_vm0, %v90_v21, 0.0  ;;  %v92_v27 = vmul.f32 %v208_v0, %v70_v23  ;;  %v75_v36 = vld [vmem:[#allocation2 + $0x68] sm:$0xff]  ;;  %v76_v41 = vld [vmem:[#allocation2 + $0x70] sm:$0xff]  ;;  %v77_v42 = vld [vmem:[#allocation2 + $0x78] sm:$0xff]  ;;  %p245_p10 = scmp.lt.s32.totalorder %s243_s27, %s239_s26 }
  0x1b   :  { %v122_v26 = vsel %vm100_vm0, %v91_v22, 0.0  ;;  %v93_v28 = vmul.f32 %v208_v0, %v71_v24  ;;  %v94_v33 = vmul.f32 %v208_v0, %v72_v29  ;;  %v95_v34 = vmul.f32 %v208_v0, %v73_v30 }
  0x1c   :  { %v125_v31 = vsel %vm100_vm0, %v92_v27, 0.0  ;;  %v96_v39 = vmul.f32 %v208_v0, %v74_v35  ;;  %v97_v40 = vmul.f32 %v208_v0, %v75_v36  ;;  %v98_v45 = vmul.f32 %v208_v0, %v76_v41  ;;  %p246_p11 = por %p245_p10, %p244_p9 }
  0x1d   :  { %111 = vadd.xlane.f32.xlu1 %v110_v14  ;;  %v128_v32 = vsel %vm100_vm0, %v93_v28, 0.0  ;;  %v131_v37 = vsel %vm100_vm0, %v94_v33, 0.0  ;;  %v134_v38 = vsel %vm100_vm0, %v95_v34, 0.0  ;;  %v99_v46 = vmul.f32 %v208_v0, %v77_v42 }
  0x1e   :  { %105 = vadd.xlane.f32.xlu0 %v104_v13  ;;  %v137_v43 = vsel %vm100_vm0, %v96_v39, 0.0  ;;  %v140_v44 = vsel %vm100_vm0, %v97_v40, 0.0  ;;  %v143_v47 = vsel %vm100_vm0, %v98_v45, 0.0  ;;  %v317_v51 = vand.u32 127, %v27_v49  ;;  %p247_p12 = pnand %p246_p11, %p240_p8 }
  0x1f   :  { %v146_v48 = vsel %vm100_vm0, %v99_v46, 0.0  ;;  %v29_v52 = vadd.s32 8, %v315_v50  ;;  %v30_v54 = vadd.s32 16, %v315_v50  ;;  %v31_v56 = vadd.s32 24, %v315_v50 }
  0x20   :  { %vm46_vm1 = vcmp.eq.s32.totalorder %v315_v50, %v317_v51  ;;  %v32_v57 = vadd.s32 32, %v315_v50  ;;  %v33_v60 = vadd.s32 40, %v315_v50  ;;  %v34_v0 = vadd.s32 48, %v315_v50 }
  0x21   :  { %117 = vadd.xlane.f32.xlu1 %v116_v20  ;;  %vm47_vm2 = vcmp.eq.s32.totalorder %v29_v52, %v317_v51  ;;  %vm48_vm3 = vcmp.eq.s32.totalorder %v30_v54, %v317_v51  ;;  %vm49_vm4 = vcmp.eq.s32.totalorder %v31_v56, %v317_v51  ;;  %v35_v6 = vadd.s32 56, %v315_v50 }
  0x22   :  { %114 = vadd.xlane.f32.xlu0 %v113_v19  ;;  %vm50_vm5 = vcmp.eq.s32.totalorder %v32_v57, %v317_v51  ;;  %vm51_vm6 = vcmp.eq.s32.totalorder %v33_v60, %v317_v51  ;;  %vm52_vm7 = vcmp.eq.s32.totalorder %v34_v0, %v317_v51  ;;  %v36_v9 = vadd.s32 64, %v315_v50 }
  0x23   :  { %vm53_vm8 = vcmp.eq.s32.totalorder %v35_v6, %v317_v51  ;;  %v37_v14 = vadd.s32 72, %v315_v50  ;;  %v38_v17 = vadd.s32 80, %v315_v50  ;;  %v39_v22 = vadd.s32 88, %v315_v50 }
  0x24   :  { %vm54_vm9 = vcmp.eq.s32.totalorder %v36_v9, %v317_v51  ;;  %v41_v30 = vadd.s32 104, %v315_v50  ;;  %v42_v33 = vadd.s32 112, %v315_v50 }
  0x25   :  { %123 = vadd.xlane.f32.xlu1 %v122_v26  ;;  %vm55_vm10 = vcmp.eq.s32.totalorder %v37_v14, %v317_v51  ;;  %vm56_vm11 = vcmp.eq.s32.totalorder %v38_v17, %v317_v51  ;;  %vm57_vm12 = vcmp.eq.s32.totalorder %v39_v22, %v317_v51 }
  0x26   :  { %120 = vadd.xlane.f32.xlu0 %v119_v25  ;;  %v40_v25 = vadd.s32 96, %v315_v50  ;;  %vm59_vm14 = vcmp.eq.s32.totalorder %v41_v30, %v317_v51  ;;  %vm60_vm15 = vcmp.eq.s32.totalorder %v42_v33, %v317_v51 }
  0x28   :  { %vm58_vm13 = vcmp.eq.s32.totalorder %v40_v25, %v317_v51 }
  0x29   :  { %129 = vadd.xlane.f32.xlu1 %v128_v32 }
  0x2a   :  { %126 = vadd.xlane.f32.xlu0 %v125_v31 }
  0x2d   :  { %135 = vadd.xlane.f32.xlu1 %v134_v38  ;;  %v43_v38 = vadd.s32 120, %v315_v50 }
  0x2e   :  { %132 = vadd.xlane.f32.xlu0 %v131_v37 }
  0x2f   :  { %vm61_vm0 = vcmp.eq.s32.totalorder %v43_v38, %v317_v51 }
  0x31   :  { %141 = vadd.xlane.f32.xlu1 %v140_v44 }
  0x32   :  { %138 = vadd.xlane.f32.xlu0 %v137_v43 }
  0x35   :  { %147 = vadd.xlane.f32.xlu1 %v146_v48 }
  0x36   :  { %144 = vadd.xlane.f32.xlu0 %v143_v47 }
  0xa6   :  { %v109_v55 = vpop.xlane.xlu1 %108 }
  0xa7   :  { %v103_v53 = vpop.xlane.xlu0 %102  ;;  %v151_v1 = vsel %vm48_vm3, %v109_v55, 0.0 }
  0xa8   :  { %v149_v61 = vsel %vm46_vm1, %v103_v53, 0.0 }
  0xaa   :  { %v112_v59 = vpop.xlane.xlu1 %111 }
  0xab   :  { %v106_v58 = vpop.xlane.xlu0 %105  ;;  %v152_v2 = vsel %vm49_vm4, %v112_v59, 0.0 }
  0xac   :  { %v150_v62 = vsel %vm47_vm2, %v106_v58, 0.0 }
  0xad   :  { %v165_v63 = vadd.f32 %v150_v62, %v149_v61 }
  0xae   :  { %v118_v5 = vpop.xlane.xlu1 %117 }
  0xaf   :  { %v166_v3 = vadd.f32 %v165_v63, %v151_v1  ;;  %v115_v4 = vpop.xlane.xlu0 %114  ;;  %v154_v10 = vsel %vm51_vm6, %v118_v5, 0.0 }
  0xb0   :  { %v153_v7 = vsel %vm50_vm5, %v115_v4, 0.0 }
  0xb1   :  { %v167_v8 = vadd.f32 %v166_v3, %v152_v2 }
  0xb2   :  { %v124_v13 = vpop.xlane.xlu1 %123 }
  0xb3   :  { %v168_v11 = vadd.f32 %v167_v8, %v153_v7  ;;  %v121_v12 = vpop.xlane.xlu0 %120  ;;  %v156_v18 = vsel %vm53_vm8, %v124_v13, 0.0 }
  0xb4   :  { %v155_v15 = vsel %vm52_vm7, %v121_v12, 0.0 }
  0xb5   :  { %v169_v16 = vadd.f32 %v168_v11, %v154_v10 }
  0xb6   :  { %v130_v21 = vpop.xlane.xlu1 %129 }
  0xb7   :  { %v170_v19 = vadd.f32 %v169_v16, %v155_v15  ;;  %v127_v20 = vpop.xlane.xlu0 %126  ;;  %v158_v26 = vsel %vm55_vm10, %v130_v21, 0.0 }
  0xb8   :  { %v157_v23 = vsel %vm54_vm9, %v127_v20, 0.0 }
  0xb9   :  { %v171_v24 = vadd.f32 %v170_v19, %v156_v18 }
  0xba   :  { %v136_v29 = vpop.xlane.xlu1 %135 }
  0xbb   :  { %v172_v27 = vadd.f32 %v171_v24, %v157_v23  ;;  %v133_v28 = vpop.xlane.xlu0 %132  ;;  %v160_v34 = vsel %vm57_vm12, %v136_v29, 0.0 }
  0xbc   :  { %v159_v31 = vsel %vm56_vm11, %v133_v28, 0.0 }
  0xbd   :  { %v173_v32 = vadd.f32 %v172_v27, %v158_v26 }
  0xbe   :  { %v142_v37 = vpop.xlane.xlu1 %141 }
  0xbf   :  { %v174_v35 = vadd.f32 %v173_v32, %v159_v31  ;;  %v139_v36 = vpop.xlane.xlu0 %138  ;;  %v162_v41 = vsel %vm59_vm14, %v142_v37, 0.0 }
  0xc0   :  { %v161_v39 = vsel %vm58_vm13, %v139_v36, 0.0 }
  0xc1   :  { %v175_v40 = vadd.f32 %v174_v35, %v160_v34 }
  0xc2   :  { %v148_v44 = vpop.xlane.xlu1 %147 }
  0xc3   :  { %v176_v42 = vadd.f32 %v175_v40, %v161_v39  ;;  %v145_v43 = vpop.xlane.xlu0 %144  ;;  %v164_v47 = vsel %vm61_vm0, %v148_v44, 0.0 }
  0xc4   :  { %v163_v45 = vsel %vm60_vm15, %v145_v43, 0.0 }
  0xc5   :  { %v177_v46 = vadd.f32 %v176_v42, %v162_v41 }
  0xc7   :  { %v178_v48 = vadd.f32 %v177_v46, %v163_v45 }
  0xc9   :  { %v179_v49 = vadd.f32 %v178_v48, %v164_v47 }
  0xcb   :  { %v180_v52 = vrot.slane %v179_v49, 4 }
  0xcd   :  { %v181_v53 = vadd.f32 %v180_v52, %v179_v49 }
  0xcf   :  { %v182_v54 = vrot.slane %v181_v53, 2 }
  0xd1   :  { %v183_v55 = vadd.f32 %v182_v54, %v181_v53 }
  0xd3   :  { %v184_v50 = vrot.slane %v183_v55, 1 }
  0xd5   :  { %v185_v56 = vadd.f32 %v184_v50, %v183_v55 }
  0xd7   :  { %v186_v57 = vsub.f32 0.0, %v185_v56 }
  0xd9   :  { %v187_v58 = vmul.f32 1.442695, %v186_v57 }
  0xdb   :  { %213 = vpow2.f32 %v187_v58 }
  0xe5   :  { %v214_v59 = vpop.eup %213 }
  0xe6   :  { %v189_v60 = vadd.f32 1.0, %v214_v59 }
  0xe8   :  { %215 = vrcp.f32 %v189_v60 }
  0xf2   :  { %v216_v51 = vpop.eup %215 }
  0xf3   :  { %192 = vst [vmem:[#allocation5] sm:$0x1] %v216_v51 }
  0xf4   :  { %250 = shalt.err (!%p247_p12)
}
  0xf5   :  { %s251_s30 = scalar_lea.hbm %s365_s2, 16 }
  0xf6   :  { %p252_p13 = scmp.ne.s32.totalorder %s365_s2, %s251_s30  ;;  %p255_p0 = scmp.lt.u32.totalorder %s251_s30, %s365_s2 }
  0xf8   :  { %p257_p1 = pnand %p255_p0, %p252_p13 }
  0xfa   :  { %260 = shalt.err (!%p257_p1)
}
  0xfb   :  { %202 = dma.vmem_to_hbm [thread:$0]  %s200_s1, 16, %s365_s2, [#allocation4]  }
  0xfc   :  { %263 = dma.done.wait [#allocation4], 16  }
  0xfd   :  { %264 = vsyncadd [#allocation4], 4294967280 }
  0xfe   :  { %206 = vsyncpa [#allocation3], 1 }
  0xff   :  { %207 = vsyncpa [#allocation4], 1 }

</bundles_post_ra>
